<compile_context>
chip_gen: v5e
topology: v5e:2x2
jax: 0.10.0
libtpu: 0.0.40
codegen_flags: <defaults>
</compile_context>

<pallas_src>
import jax
import jax.numpy as jnp
from jax.experimental import pallas as pl
from jax.experimental.pallas import tpu as pltpu

EPS = 1e-6
_VMEM_TILE_BUDGET_BYTES = 40 * 1024 * 1024   # keep well under v7x's 64 MiB VMEM
_VMEM_LIMIT_BYTES = 48 * 1024 * 1024
_MAX_TILE_ROWS = 2048


def _layernorm_kernel(alpha_ref, bias_ref, x_ref, o_ref):
    # x_ref: (TM, D) tile in VMEM; alpha/bias: (1,) scalars in SMEM.
    x = x_ref[...]
    if x.dtype != jnp.float32:
        # only upcast sub-32-bit inputs; fp32 path avoids a full-tile copy
        x = x.astype(jnp.float32)
    d = x.shape[-1]
    mean = jnp.mean(x, axis=-1, keepdims=True)
    diff = x - mean
    # torch.std is unbiased (divides by N-1) by default; guard D == 1.
    var = jnp.sum(diff * diff, axis=-1, keepdims=True) / max(d - 1, 1)
    std = jnp.sqrt(var)
    # One reciprocal per row (EUP) instead of D divisions per row (VALU).
    # approx=False keeps the result exact to the 1e-5 reference tolerance.
    inv = pl.reciprocal(std + EPS, approx=False)          # (TM, 1)
    scale = alpha_ref[0] * inv                            # fold alpha per-row
    out = diff * scale + bias_ref[0]
    o_ref[...] = out.astype(o_ref.dtype)


def _pick_tile_rows(n_rows: int, d: int, itemsize: int) -> int:
    """Largest multiple-of-8 row tile that fits the VMEM budget."""
    # double-buffered input + output; compute inflates sub-32-bit to fp32
    bytes_per_row = 2 * d * (itemsize + max(itemsize, 4))
    t = _VMEM_TILE_BUDGET_BYTES // max(bytes_per_row, 1)
    t = min(t, _MAX_TILE_ROWS)
    t = min(t, -(-n_rows // 8) * 8)      # no point exceeding the row count
    t = max((t // 8) * 8, 8)             # multiple of 8 sublanes, at least 8
    return int(t)


def layer_norm_pallas(x_2d, alpha, bias, *, tile_rows=None):
    """x_2d: (N, D). Returns alpha*(x-mean)/(std+eps)+bias row-wise."""
    n, d = x_2d.shape
    if tile_rows is None:
        tile_rows = _pick_tile_rows(n, d, jnp.dtype(x_2d.dtype).itemsize)

    return pl.pallas_call(
        _layernorm_kernel,
        out_shape=jax.ShapeDtypeStruct((n, d), x_2d.dtype),
        grid_spec=pltpu.PrefetchScalarGridSpec(
            num_scalar_prefetch=0,
            grid=(pl.cdiv(n, tile_rows),),   # partial last block is masked
            in_specs=[
                pl.BlockSpec(memory_space=pltpu.SMEM),  # alpha (1,)
                pl.BlockSpec(memory_space=pltpu.SMEM),  # bias  (1,)
                pl.BlockSpec((tile_rows, d), lambda i: (i, 0)),
            ],
            out_specs=pl.BlockSpec((tile_rows, d), lambda i: (i, 0)),
        ),
        compiler_params=pltpu.CompilerParams(
            dimension_semantics=("parallel",),
            vmem_limit_bytes=_VMEM_LIMIT_BYTES,
        ),
    )(alpha, bias, x_2d)


class Decoder:
    """JAX/Pallas port of the PyTorch Decoder module."""

    def __init__(self, num_layers: int = 0):
        # TODO(synk): decoder layers are opaque (externally supplied
        # nn.ModuleList) -> identity pass-throughs.
        self.num_layers = num_layers
        # LayerNormalization parameters: alpha=ones(1), bias=zeros(1).
        self.alpha = jnp.ones((1,), dtype=jnp.float32)
        self.bias = jnp.zeros((1,), dtype=jnp.float32)

    def __call__(self, x, encoder_output, src_mask, tgt_mask):
        for _ in range(self.num_layers):
            x = x  # identity placeholder for each opaque decoder layer
        b, s, d = x.shape
        x2 = x.reshape(b * s, d)
        y2 = layer_norm_pallas(x2, self.alpha, self.bias)
        return y2.reshape(b, s, d)


def _reference_layernorm(x, alpha, bias, eps=EPS):
    mean = jnp.mean(x, axis=-1, keepdims=True)
    var = jnp.sum((x - mean) ** 2, axis=-1, keepdims=True) / (x.shape[-1] - 1)
    std = jnp.sqrt(var)
    return alpha * (x - mean) / (std + eps) + bias


if __name__ == "__main__":
    key = jax.random.PRNGKey(0)
    k1, k2, k3 = jax.random.split(key, 3)

    # d_model = 128 keeps the feature axis lane-dense (full-width stores).
    B, S, D = 2, 8, 128
    x = jax.random.normal(k1, (B, S, D), dtype=jnp.float32)
    encoder_output = jax.random.normal(k2, (B, S, D), dtype=jnp.float32)
    src_mask = jnp.ones((B, 1, 1, S), dtype=jnp.float32)
    tgt_mask = jnp.tril(jnp.ones((S, S), dtype=jnp.float32))[None, None]

    decoder = Decoder(num_layers=0)
    out = decoder(x, encoder_output, src_mask, tgt_mask)
    out = jax.block_until_ready(out)

    ref = _reference_layernorm(x, decoder.alpha[0], decoder.bias[0])
    assert out.shape == (B, S, D)
    assert jnp.allclose(out, ref, atol=1e-5, rtol=1e-5)

    # Also exercise the masked partial last block (row count not a multiple
    # of the tile) by forcing a small tile on a non-divisible row count.
    x_odd = jax.random.normal(k3, (20, D), dtype=jnp.float32)
    y_odd = jax.block_until_ready(
        layer_norm_pallas(x_odd, decoder.alpha, decoder.bias, tile_rows=16))
    ref_odd = _reference_layernorm(x_odd, decoder.alpha[0], decoder.bias[0])
    assert jnp.allclose(y_odd, ref_odd, atol=1e-5, rtol=1e-5)

    print("KERNEL_OK")
</pallas_src>

<mosaic_0001>
module attributes {stable_mosaic.version = 11 : i64} {
  func.func @_layernorm_kernel(%arg0: i32, %arg1: memref<1xf32, #tpu.memory_space<smem>>, %arg2: memref<1xf32, #tpu.memory_space<smem>>, %arg3: memref<16x128xf32, #tpu.memory_space<vmem>>, %arg4: memref<16x128xf32, #tpu.memory_space<vmem>>) attributes {dimension_semantics = [#tpu.dimension_semantics<parallel>], iteration_bounds = array<i64: 1>, scalar_prefetch = 0 : i64, scratch_operands = 0 : i64, tpu.core_type = #tpu.core_type<tc>, window_params = [{transform_indices = @transform_0, window_bounds = array<i64: 1>}, {transform_indices = @transform_1, window_bounds = array<i64: 1>}, {transform_indices = @transform_2, window_bounds = array<i64: 16, 128>}, {transform_indices = @transform_3, window_bounds = array<i64: 16, 128>}]} {
    %c0 = arith.constant 0 : index
    %c0_0 = arith.constant 0 : index
    %0 = vector.load %arg3[%c0, %c0_0] : memref<16x128xf32, #tpu.memory_space<vmem>>, vector<16x128xf32>
    %cst = arith.constant dense<0.000000e+00> : vector<16xf32>
    %1 = vector.multi_reduction <add>, %0, %cst [1] : vector<16x128xf32> to vector<16xf32>
    %2 = vector.shape_cast %1 : vector<16xf32> to vector<16x1xf32>
    %cst_1 = arith.constant 1.280000e+02 : f32
    %3 = vector.broadcast %cst_1 : f32 to vector<16x1xf32>
    %4 = arith.divf %2, %3 : vector<16x1xf32>
    %5 = vector.broadcast %4 : vector<16x1xf32> to vector<16x128xf32>
    %6 = arith.subf %0, %5 : vector<16x128xf32>
    %7 = arith.mulf %6, %6 : vector<16x128xf32>
    %cst_2 = arith.constant dense<0.000000e+00> : vector<16xf32>
    %8 = vector.multi_reduction <add>, %7, %cst_2 [1] : vector<16x128xf32> to vector<16xf32>
    %9 = vector.shape_cast %8 : vector<16xf32> to vector<16x1xf32>
    %cst_3 = arith.constant 1.270000e+02 : f32
    %10 = vector.broadcast %cst_3 : f32 to vector<16x1xf32>
    %11 = arith.divf %9, %10 : vector<16x1xf32>
    %12 = math.sqrt %11 : vector<16x1xf32>
    %cst_4 = arith.constant 9.99999997E-7 : f32
    %13 = vector.broadcast %cst_4 : f32 to vector<16x1xf32>
    %14 = arith.addf %12, %13 : vector<16x1xf32>
    %15 = tpu.reciprocal %14 : vector<16x1xf32> -> vector<16x1xf32>
    %c0_5 = arith.constant 0 : index
    %16 = memref.load %arg1[%c0_5] : memref<1xf32, #tpu.memory_space<smem>>
    %17 = vector.broadcast %16 : f32 to vector<16x1xf32>
    %18 = arith.mulf %17, %15 : vector<16x1xf32>
    %19 = vector.broadcast %18 : vector<16x1xf32> to vector<16x128xf32>
    %20 = arith.mulf %6, %19 : vector<16x128xf32>
    %c0_6 = arith.constant 0 : index
    %21 = memref.load %arg2[%c0_6] : memref<1xf32, #tpu.memory_space<smem>>
    %22 = vector.broadcast %21 : f32 to vector<16x128xf32>
    %23 = arith.addf %20, %22 : vector<16x128xf32>
    %c0_7 = arith.constant 0 : index
    %c0_8 = arith.constant 0 : index
    %24 = vector.load %arg4[%c0_7, %c0_8] : memref<16x128xf32, #tpu.memory_space<vmem>>, vector<16x128xf32>
    tpu.vector_store %arg4[%c0_7, %c0_8], %23 {strides = array<i32>} : memref<16x128xf32, #tpu.memory_space<vmem>>, vector<16x128xf32>,
    return
  }
  func.func @transform_0(%arg0: i32) -> i32 {
    %c0_i32 = arith.constant 0 : i32
    %c0_i32_0 = arith.constant 0 : i32
    return %c0_i32 : i32
  }
  func.func @transform_1(%arg0: i32) -> i32 {
    %c0_i32 = arith.constant 0 : i32
    %c0_i32_0 = arith.constant 0 : i32
    return %c0_i32 : i32
  }
  func.func @transform_2(%arg0: i32) -> (i32, i32) {
    %c0_i32 = arith.constant 0 : i32
    %c0_i32_0 = arith.constant 0 : i32
    return %arg0, %c0_i32 : i32, i32
  }
  func.func @transform_3(%arg0: i32) -> (i32, i32) {
    %c0_i32 = arith.constant 0 : i32
    %c0_i32_0 = arith.constant 0 : i32
    return %arg0, %c0_i32 : i32, i32
  }
}

</mosaic_0001>

<bundles_post_ra>
// kernel: tpu_custom_call.1
= control target key start
LH: loop header
LB: loop body
LE: loop exit
PB: predicated region body
PF: predicated region fallthrough
CT: control target
= control target key end

     0   :  { %10 = vsyncpa [#allocation5], 0  ;;  %s274_s0 = inlined_call_operand.<no memory space> [shape: f32[1], index: 0, kind: input, shape index: {}]   ;;  %s275_s1 = inlined_call_operand.<no memory space> [shape: f32[1], index: 1, kind: input, shape index: {}]   ;;  %s276_s2 = inlined_call_operand.hbm [shape: f32[16,128], index: 2, kind: input, shape index: {}]   ;;  %s277_s3 = inlined_call_operand.hbm [shape: f32[16,128], index: 3, kind: output, shape index: {}]  }
   0x1   :  { %11 = vsyncpa [#allocation6], 0  ;;  %s20_s14 = sshll.u32 %s276_s2, 4  ;;  %s220_s15 = smov [#allocation4]   ;;  %s21_s14 = int_to_ptr.hbm [resolvable:$true] %s20_s14 }
   0x2   :  { %s22_s16 = sshll.u32 %s220_s15, 4  ;;  %s221_s17 = smov 128   ;;  %s23_s16 = int_to_ptr.vmem [resolvable:$true] %s22_s16 }
   0x3   :  { %s222_s18 = smov 8  }
   0x4   :  { %28 = dma.hbm_to_vmem [thread:$0]  %s21_s14, 256, %s23_s16, [#allocation5], %s221_s17, %s221_s17, %s222_s18  }
   0x5   :  { %216 = dma.done.wait [#allocation5], 256  }
   0x6   :  { %217 = vsyncadd [#allocation5], 4294967040  ;;  %v33_v0 = vld [vmem:[#allocation4] sm:$0xff]  ;;  %v34_v1 = vld [vmem:[#allocation4 + $0x8] sm:$0xff]  ;;  %v223_v2 = vmov 128.0   ;;  %v224_v17 = vmov 127.0   ;;  %v120_v59 = vstv %s274_s0 }
   0x7   :  { %35 = vadd.xlane.f32.xlu0 %v33_v0  ;;  %156 = vrcp.f32 %v223_v2  ;;  %v126_v2 = vstv %s275_s1  ;;  %s225_s0 = smov [#allocation7]   ;;  %s137_s1 = sshll.u32 %s277_s3, 4  ;;  %s138_s1 = int_to_ptr.hbm [resolvable:$true] %s137_s1 }
   0x8   :  { %158 = vrcp.f32 %v224_v17  ;;  %s135_s22 = sshll.u32 %s225_s0, 4  ;;  %s136_s22 = int_to_ptr.vmem [resolvable:$true] %s135_s22 }
   0xd   :  { %v157_v3 = vpop.eup %156 }
   0xe   :  { %v40_v4 = vmul.f32 128.0, %v157_v3  ;;  %vm44_vm0 = vweird.f32 %v157_v3  ;;  %v159_v18 = vpop.eup %158 }
   0xf   :  { %37 = vadd.xlane.f32.xlu0 %v34_v1  ;;  %v57_v19 = vmul.f32 127.0, %v159_v18  ;;  %vm61_vm1 = vweird.f32 %v159_v18 }
  0x10   :  { %v41_v5 = vsub.f32 1.0, %v40_v4 }
  0x11   :  { %v58_v20 = vsub.f32 1.0, %v57_v19 }
  0x12   :  { %v42_v6 = vmul.f32 %v157_v3, %v41_v5 }
  0x13   :  { %v59_v21 = vmul.f32 %v159_v18, %v58_v20 }
  0x14   :  { %v43_v7 = vadd.f32 %v157_v3, %v42_v6 }
  0x15   :  { %v60_v22 = vadd.f32 %v159_v18, %v59_v21 }
  0x16   :  { %v45_v8 = vsel %vm44_vm0, %v157_v3, %v43_v7 }
  0x17   :  { %v62_v23 = vsel %vm61_vm1, %v159_v18, %v60_v22 }
  0x7a   :  { %v36_v9 = vpop.xlane.xlu0 %35 }
  0x7b   :  { %v46_v10 = vmul.f32 %v45_v8, %v36_v9 }
  0x7d   :  { %v252_v11 = vsub.f32 %v33_v0, %v46_v10 }
  0x7f   :  { %v50_v12 = vmul.f32 %v252_v11, %v252_v11 }
  0x81   :  { %52 = vadd.xlane.f32.xlu1 %v50_v12 }
  0x82   :  { %v38_v13 = vpop.xlane.xlu0 %37 }
  0x83   :  { %v47_v14 = vmul.f32 %v45_v8, %v38_v13 }
  0x85   :  { %v256_v15 = vsub.f32 %v34_v1, %v47_v14 }
  0x87   :  { %v51_v16 = vmul.f32 %v256_v15, %v256_v15 }
  0x89   :  { %54 = vadd.xlane.f32.xlu1 %v51_v16 }
  0xf4   :  { %v53_v24 = vpop.xlane.xlu1 %52 }
  0xf5   :  { %v63_v25 = vmul.f32 %v62_v23, %v53_v24 }
  0xf7   :  { %160 = vrsqrt.f32 %v63_v25  ;;  %vm72_vm2 = vcmp.eq.f32.partialorder %v63_v25, inf  ;;  %v75_v38 = vand.u32 2147483648, %v63_v25  ;;  %vm74_vm3 = vcmp.eq.f32.partialorder %v63_v25, 0.0 }
  0xfc   :  { %v55_v26 = vpop.xlane.xlu1 %54 }
  0xfd   :  { %v161_v27 = vpop.eup %160  ;;  %v64_v28 = vmul.f32 %v62_v23, %v55_v26 }
  0xfe   :  { %v66_v29 = vmul.f32 %v161_v27, %v63_v25 }
  0xff   :  { %162 = vrsqrt.f32 %v64_v28  ;;  %vm84_vm4 = vcmp.eq.f32.partialorder %v64_v28, inf  ;;  %v87_v46 = vand.u32 2147483648, %v64_v28  ;;  %vm86_vm5 = vcmp.eq.f32.partialorder %v64_v28, 0.0 }
 0x100   :  { %v67_v30 = vmul.f32 %v161_v27, %v66_v29 }
 0x102   :  { %v68_v31 = vmul.f32 0.5, %v67_v30 }
 0x104   :  { %v69_v32 = vsub.f32 1.5, %v68_v31 }
 0x105   :  { %v163_v33 = vpop.eup %162 }
 0x106   :  { %v70_v34 = vmul.f32 %v161_v27, %v69_v32  ;;  %v78_v35 = vmul.f32 %v163_v33, %v64_v28 }
 0x108   :  { %v71_v36 = vmul.f32 %v70_v34, %v63_v25  ;;  %v79_v37 = vmul.f32 %v163_v33, %v78_v35 }
 0x10a   :  { %v73_v39 = vsel %vm72_vm2, %v63_v25, %v71_v36  ;;  %v80_v40 = vmul.f32 0.5, %v79_v37 }
 0x10b   :  { %v76_v41 = vsel %vm74_vm3, %v75_v38, %v73_v39 }
 0x10c   :  { %v89_v42 = vadd.f32 1e-06, %v76_v41  ;;  %v81_v43 = vsub.f32 1.5, %v80_v40 }
 0x10e   :  { %164 = vrcp.f32 %v89_v42  ;;  %v82_v44 = vmul.f32 %v163_v33, %v81_v43  ;;  %v102_v53 = vand.u32 2147483648, %v89_v42  ;;  %v100_v55 = vand.u32 2147483647, %v89_v42 }
 0x10f   :  { %vm96_vm7 = vweird.f32 %v89_v42 }
 0x110   :  { %v83_v45 = vmul.f32 %v82_v44, %v64_v28  ;;  %v103_v58 = vor.u32 1.1754944e-38, %v102_v53  ;;  %vm101_vm9 = vcmp.eq.f32.partialorder %v100_v55, 8.507059e+37 }
 0x112   :  { %v85_v47 = vsel %vm84_vm4, %v64_v28, %v83_v45 }
 0x113   :  { %v88_v48 = vsel %vm86_vm5, %v87_v46, %v85_v47 }
 0x114   :  { %v165_v49 = vpop.eup %164  ;;  %v90_v50 = vadd.f32 1e-06, %v88_v48 }
 0x115   :  { %v92_v51 = vmul.f32 %v165_v49, %v89_v42  ;;  %vm97_vm6 = vweird.f32 %v165_v49 }
 0x116   :  { %166 = vrcp.f32 %v90_v50  ;;  %vm98_vm8 = vmor %vm96_vm7, %vm97_vm6  ;;  %v116_v1 = vand.u32 2147483648, %v90_v50  ;;  %v114_v4 = vand.u32 2147483647, %v90_v50  ;;  %vm110_vm11 = vweird.f32 %v90_v50 }
 0x117   :  { %v93_v52 = vsub.f32 1.0, %v92_v51 }
 0x118   :  { %v117_v8 = vor.u32 1.1754944e-38, %v116_v1  ;;  %vm115_vm13 = vcmp.eq.f32.partialorder %v114_v4, 8.507059e+37 }
 0x119   :  { %v94_v54 = vmul.f32 %v165_v49, %v93_v52 }
 0x11b   :  { %v95_v56 = vadd.f32 %v165_v49, %v94_v54 }
 0x11c   :  { %v167_v57 = vpop.eup %166 }
 0x11d   :  { %v99_v60 = vsel %vm98_vm8, %v165_v49, %v95_v56  ;;  %v106_v61 = vmul.f32 %v167_v57, %v90_v50  ;;  %vm111_vm10 = vweird.f32 %v167_v57 }
 0x11e   :  { %v104_v62 = vsel %vm101_vm9, %v103_v58, %v99_v60  ;;  %vm112_vm12 = vmor %vm110_vm11, %vm111_vm10 }
 0x11f   :  { %v107_v63 = vsub.f32 1.0, %v106_v61  ;;  %v121_v0 = vmul.f32 %v120_v59, %v104_v62 }
 0x121   :  { %v108_v3 = vmul.f32 %v167_v57, %v107_v63  ;;  %v123_v5 = vmul.f32 %v121_v0, %v252_v11 }
 0x123   :  { %v109_v6 = vadd.f32 %v167_v57, %v108_v3  ;;  %v127_v7 = vadd.f32 %v126_v2, %v123_v5 }
 0x125   :  { %v113_v9 = vsel %vm112_vm12, %v167_v57, %v109_v6  ;;  %129 = vst [vmem:[#allocation7] sm:$0xff] %v127_v7 }
 0x126   :  { %v118_v10 = vsel %vm115_vm13, %v117_v8, %v113_v9 }
 0x127   :  { %v122_v12 = vmul.f32 %v120_v59, %v118_v10 }
 0x129   :  { %v124_v13 = vmul.f32 %v122_v12, %v256_v15 }
 0x12b   :  { %v128_v14 = vadd.f32 %v126_v2, %v124_v13 }
 0x12d   :  { %130 = vst [vmem:[#allocation7 + $0x8] sm:$0xff] %v128_v14 }
 0x12e   :  { %143 = dma.vmem_to_hbm [thread:$0]  %s136_s22, 256, %s138_s1, [#allocation6], %s221_s17, %s221_s17, %s222_s18  }
 0x12f   :  { %218 = dma.done.wait [#allocation6], 256  }
 0x130   :  { %219 = vsyncadd [#allocation6], 4294967040 }
 0x131   :  { %148 = vsyncpa [#allocation5], 1 }
 0x132   :  { %149 = vsyncpa [#allocation6], 1 }

</bundles_post_ra>
